<compile_context>
chip_gen: v5e
topology: v5e:2x2
jax: 0.10.0
libtpu: 0.0.40
codegen_flags: <defaults>
</compile_context>

<pallas_src>
import functools

import jax
import jax.numpy as jnp
import numpy as np
from jax import lax
from jax.experimental import pallas as pl
from jax.experimental.pallas import tpu as pltpu

BN_EPS = 1e-5


def _residual_block_kernel(xp_ref, wb1_ref, wb2_ref,
                           g1_ref, b1_ref, g2_ref, b2_ref, o_ref,
                           *, n, h, w, c):
    # xp_ref:  (R, W*C) f32  H-padded input rows, (W, C) packed on the lane axis,
    #                        R = N*(H+2) rounded up to a sublane multiple; all
    #                        pad rows (H-pad + tail) are zero.
    # wb*_ref: (3*W*C, W*C) bf16  banded conv weights, kh taps stacked along K.
    # g*/b*:   (1, W*C) f32  BN gamma / beta tiled over W.
    # o_ref:   (R, W*C) f32  output in the same padded row coordinates.
    R, WC = xp_ref.shape
    hp = h + 2
    inv_nhw = 1.0 / float(n * h * w)

    xp = xp_ref[...]                                   # f32, pad rows zero

    # Valid-row mask: 1.0 on the N*H real rows, 0.0 on H-pad / tail-pad rows.
    # Built from comparisons only (no int div/mod), hoisted and reused.
    row = lax.broadcasted_iota(jnp.int32, (R, WC), 0)
    valid = row < 0
    for i in range(n):
        valid = valid | ((row >= i * hp + 1) & (row <= i * hp + h))
    mask = valid.astype(jnp.float32)

    def conv3x3(src, w_ref):
        # One lane-dense K=3*WC bf16 MXU matmul: kh taps come from sublane
        # rolls of the padded buffer (pad rows are zero, so the cyclic rolls
        # never leak data across images), kw taps live in the banded weights.
        up = pltpu.roll(src, 1, axis=0)                # up[r] = src[r-1]
        dn = pltpu.roll(src, R - 1, axis=0)            # dn[r] = src[r+1]
        lhs = jnp.concatenate([up, src, dn], axis=-1).astype(jnp.bfloat16)
        return jnp.dot(lhs, w_ref[...], preferred_element_type=jnp.float32)

    def channel_avg(rowvec):
        # Sum the W lane-replicas of each channel with a log2(W) roll butterfly
        # (XLU slots have slack here), then scale by 1/(N*H*W): per-channel
        # batch statistic broadcast back across the packed (W, C) lane axis.
        s = rowvec
        shift = c
        while shift < WC:
            s = s + pltpu.roll(s, shift, axis=1)
            shift *= 2
        return s * inv_nhw

    def batchnorm(y, g_ref, b_ref):
        # Training-mode BN: per-channel batch stats over (N, H, W), biased var.
        ym = y * mask
        mean = channel_avg(jnp.sum(ym, axis=0, keepdims=True))
        d = (y - mean) * mask
        var = channel_avg(jnp.sum(d * d, axis=0, keepdims=True))
        scale = g_ref[...] * lax.rsqrt(var + BN_EPS)
        return d * scale + b_ref[...]

    # conv1 -> bn1 -> relu ; re-zero pad rows so conv2's rolls stay correct.
    y = jnp.maximum(batchnorm(conv3x3(xp, wb1_ref), g1_ref, b1_ref), 0.0) * mask
    # conv2 -> bn2
    y = batchnorm(conv3x3(y, wb2_ref), g2_ref, b2_ref)
    # residual adds + ReLUs (applied twice, exactly as in the PyTorch forward).
    y = jnp.maximum(y + xp, 0.0)
    y = jnp.maximum(y + xp, 0.0)
    o_ref[...] = y


def _banded_conv_weights(w_oihw, width):
    """(Cout, Cin, 3, 3) PyTorch OIHW weights -> (3*W*Cin, W*Cout) bf16 matrix.

    kh blocks are stacked along K (matching the [row-1, row, row+1] lane-concat
    of the LHS); within a block,
        B[w_in*Cin + ci, w_out*Cout + co] = w[co, ci, kh, w_in - w_out + 1]
    (zero outside |w_in - w_out| <= 1), so the kw taps and W-padding are folded
    into one lane-dense contraction.
    """
    wt = np.transpose(np.asarray(w_oihw, dtype=np.float32), (2, 3, 1, 0))  # (3,3,Ci,Co)
    cin, cout = wt.shape[2], wt.shape[3]
    kh_mats = []
    for kh in range(3):
        m = np.zeros((width * cin, width * cout), np.float32)
        for kw in range(3):
            shift = np.eye(width, k=1 - kw, dtype=np.float32)
            m += np.kron(shift, wt[kh, kw])
        kh_mats.append(m)
    return jnp.asarray(np.concatenate(kh_mats, axis=0), dtype=jnp.bfloat16)


def residual_block(x_nchw, w1, g1, b1, w2, g2, b2):
    """x_nchw: (N, C, H, W). w1/w2: (C, C, 3, 3) OIHW. g*/b*: (C,)."""
    N, C, H, W = x_nchw.shape
    assert w1.shape == (C, C, 3, 3) and w2.shape == (C, C, 3, 3)  # downsample=None
    WC = W * C
    assert WC % 128 == 0, "lane packing assumes W*C is a multiple of 128"
    assert W > 0 and (W & (W - 1)) == 0, "channel butterfly assumes power-of-two W"

    Hp = H + 2
    Rp = ((N * Hp + 7) // 8) * 8        # pad row count to a sublane multiple

    # Wrapper-side layout plumbing only: NCHW -> (N, H+2, W*C) with (W, C) on
    # the lane axis, one zero H-pad row per side, flattened and tail-padded.
    x_rows = jnp.transpose(x_nchw, (0, 2, 3, 1)).reshape(N, H, WC)
    x_pad = jnp.pad(x_rows, ((0, 0), (1, 1), (0, 0))).reshape(N * Hp, WC)
    x_pad = jnp.pad(x_pad, ((0, Rp - N * Hp), (0, 0))).astype(jnp.float32)

    wb1 = _banded_conv_weights(w1, W)
    wb2 = _banded_conv_weights(w2, W)

    g1t = jnp.tile(g1.astype(jnp.float32), W).reshape(1, WC)
    b1t = jnp.tile(b1.astype(jnp.float32), W).reshape(1, WC)
    g2t = jnp.tile(g2.astype(jnp.float32), W).reshape(1, WC)
    b2t = jnp.tile(b2.astype(jnp.float32), W).reshape(1, WC)

    flops = int(2 * (2 * Rp * (3 * WC) * WC))            # two K=3*WC matmuls
    bytes_accessed = int(x_pad.size * 4 + wb1.size * 2 + wb2.size * 2
                         + 4 * WC * 4 + Rp * WC * 4)

    vmem = pl.BlockSpec(memory_space=pltpu.MemorySpace.VMEM)
    kernel = functools.partial(_residual_block_kernel, n=N, h=H, w=W, c=C)
    out = pl.pallas_call(
        kernel,
        out_shape=jax.ShapeDtypeStruct((Rp, WC), jnp.float32),
        in_specs=[vmem] * 7,
        out_specs=vmem,
        cost_estimate=pl.CostEstimate(flops=flops, transcendentals=2 * WC,
                                      bytes_accessed=bytes_accessed),
    )(x_pad, wb1, wb2, g1t, b1t, g2t, b2t)

    # Drop H-pad / tail-pad rows and return NCHW.
    out_nhwc = out[:N * Hp].reshape(N, Hp, W, C)[:, 1:H + 1]
    return jnp.transpose(out_nhwc, (0, 3, 1, 2)).astype(x_nchw.dtype)


def _reference(x_nchw, w1, g1, b1, w2, g2, b2):
    # Pure-JAX f32 reference with exact module semantics for validation.
    x = jnp.transpose(x_nchw, (0, 2, 3, 1)).astype(jnp.float32)

    def conv(y, w):
        return jax.lax.conv_general_dilated(
            y, jnp.transpose(w, (2, 3, 1, 0)).astype(jnp.float32),
            window_strides=(1, 1), padding=((1, 1), (1, 1)),
            dimension_numbers=("NHWC", "HWIO", "NHWC"))

    def bn(y, g, b):
        m = jnp.mean(y, axis=(0, 1, 2), keepdims=True)
        v = jnp.mean(jnp.square(y - m), axis=(0, 1, 2), keepdims=True)
        return (y - m) * jax.lax.rsqrt(v + BN_EPS) * g.reshape(1, 1, 1, -1) \
            + b.reshape(1, 1, 1, -1)

    out = jnp.maximum(bn(conv(x, w1), g1, b1), 0.0)
    out = bn(conv(out, w2), g2, b2)
    res = x
    out = jnp.maximum(out + res, 0.0)
    out = jnp.maximum(out + res, 0.0)
    return jnp.transpose(out, (0, 3, 1, 2)).astype(x_nchw.dtype)


if __name__ == "__main__":
    N, C, H, W = 2, 8, 16, 16  # in_channels == out_channels, stride=1, downsample=None

    key = jax.random.PRNGKey(0)
    kx, kw1, kw2 = jax.random.split(key, 3)

    x = jax.random.normal(kx, (N, C, H, W), dtype=jnp.float32)
    fan_in = C * 3 * 3
    bound = float(np.sqrt(1.0 / fan_in))
    w1 = jax.random.uniform(kw1, (C, C, 3, 3), jnp.float32, -bound, bound)
    w2 = jax.random.uniform(kw2, (C, C, 3, 3), jnp.float32, -bound, bound)
    # BatchNorm2d init: weight=1, bias=0
    g1 = jnp.ones((C,), jnp.float32)
    b1 = jnp.zeros((C,), jnp.float32)
    g2 = jnp.ones((C,), jnp.float32)
    b2 = jnp.zeros((C,), jnp.float32)

    out = jax.block_until_ready(residual_block(x, w1, g1, b1, w2, g2, b2))
    ref = jax.block_until_ready(_reference(x, w1, g1, b1, w2, g2, b2))

    # Conv operands are fed to the MXU in bf16 (f32 accumulation), so compare
    # against the exact-f32 reference with a bf16-level tolerance.
    np.testing.assert_allclose(np.asarray(out), np.asarray(ref), rtol=3e-2, atol=3e-2)

    print("KERNEL_OK")
</pallas_src>

<mosaic_0001>
module attributes {stable_mosaic.version = 11 : i64} {
  func.func @_residual_block_kernel(%arg0: memref<40x128xf32, #tpu.memory_space<vmem>>, %arg1: memref<384x128xbf16, #tpu.memory_space<vmem>>, %arg2: memref<384x128xbf16, #tpu.memory_space<vmem>>, %arg3: memref<1x128xf32, #tpu.memory_space<vmem>>, %arg4: memref<1x128xf32, #tpu.memory_space<vmem>>, %arg5: memref<1x128xf32, #tpu.memory_space<vmem>>, %arg6: memref<1x128xf32, #tpu.memory_space<vmem>>, %arg7: memref<40x128xf32, #tpu.memory_space<vmem>>) attributes {dimension_semantics = [], scalar_prefetch = 0 : i64, scratch_operands = 0 : i64, tpu.core_type = #tpu.core_type<tc>} {
    %c0 = arith.constant 0 : index
    %c0_0 = arith.constant 0 : index
    %0 = vector.load %arg0[%c0, %c0_0] : memref<40x128xf32, #tpu.memory_space<vmem>>, vector<40x128xf32>
    %1 = tpu.iota {dimensions = array<i32: 0>} : vector<40x128xi32>
    %c0_i32 = arith.constant 0 : i32
    %2 = vector.broadcast %c0_i32 : i32 to vector<40x128xi32>
    %3 = arith.cmpi slt, %1, %2 : vector<40x128xi32>
    %c1_i32 = arith.constant 1 : i32
    %4 = vector.broadcast %c1_i32 : i32 to vector<40x128xi32>
    %5 = arith.cmpi sge, %1, %4 : vector<40x128xi32>
    %c16_i32 = arith.constant 16 : i32
    %6 = vector.broadcast %c16_i32 : i32 to vector<40x128xi32>
    %7 = arith.cmpi sle, %1, %6 : vector<40x128xi32>
    %8 = arith.andi %5, %7 : vector<40x128xi1>
    %9 = arith.ori %3, %8 : vector<40x128xi1>
    %c19_i32 = arith.constant 19 : i32
    %10 = vector.broadcast %c19_i32 : i32 to vector<40x128xi32>
    %11 = arith.cmpi sge, %1, %10 : vector<40x128xi32>
    %c34_i32 = arith.constant 34 : i32
    %12 = vector.broadcast %c34_i32 : i32 to vector<40x128xi32>
    %13 = arith.cmpi sle, %1, %12 : vector<40x128xi32>
    %14 = arith.andi %11, %13 : vector<40x128xi1>
    %15 = arith.ori %9, %14 : vector<40x128xi1>
    %16 = arith.extui %15 : vector<40x128xi1> to vector<40x128xi32>
    %17 = arith.sitofp %16 : vector<40x128xi32> to vector<40x128xf32>
    %c1_i32_1 = arith.constant 1 : i32
    %18 = tpu.dynamic_rotate %0 by %c1_i32_1 dim 0 : vector<40x128xf32>, i32 -> vector<40x128xf32>
    %c39_i32 = arith.constant 39 : i32
    %19 = tpu.dynamic_rotate %0 by %c39_i32 dim 0 : vector<40x128xf32>, i32 -> vector<40x128xf32>
    %20 = tpu.concatenate %18, %0, %19 in 1 : vector<40x128xf32>, vector<40x128xf32>, vector<40x128xf32> -> vector<40x384xf32>
    %21 = arith.truncf %20 : vector<40x384xf32> to vector<40x384xbf16>
    %c0_2 = arith.constant 0 : index
    %c0_3 = arith.constant 0 : index
    %22 = vector.load %arg1[%c0_2, %c0_3] : memref<384x128xbf16, #tpu.memory_space<vmem>>, vector<384x128xbf16>
    %cst = arith.constant dense<0.000000e+00> : vector<40x128xf32>
    %23 = tpu.matmul %21, %22, %cst {dimension_numbers = #tpu.dot_dimension_numbers<[1], [0], [0], [1], [0, 0, 1, 1], [], []>} : vector<40x384xbf16>, vector<384x128xbf16>, vector<40x128xf32> -> vector<40x128xf32>
    %24 = arith.mulf %23, %17 : vector<40x128xf32>
    %cst_4 = arith.constant dense<0.000000e+00> : vector<128xf32>
    %25 = vector.multi_reduction <add>, %24, %cst_4 [0] : vector<40x128xf32> to vector<128xf32>
    %26 = vector.shape_cast %25 : vector<128xf32> to vector<1x128xf32>
    %c8_i32 = arith.constant 8 : i32
    %27 = tpu.dynamic_rotate %26 by %c8_i32 dim 1 : vector<1x128xf32>, i32 -> vector<1x128xf32>
    %28 = arith.addf %26, %27 : vector<1x128xf32>
    %c16_i32_5 = arith.constant 16 : i32
    %29 = tpu.dynamic_rotate %28 by %c16_i32_5 dim 1 : vector<1x128xf32>, i32 -> vector<1x128xf32>
    %30 = arith.addf %28, %29 : vector<1x128xf32>
    %c32_i32 = arith.constant 32 : i32
    %31 = tpu.dynamic_rotate %30 by %c32_i32 dim 1 : vector<1x128xf32>, i32 -> vector<1x128xf32>
    %32 = arith.addf %30, %31 : vector<1x128xf32>
    %c64_i32 = arith.constant 64 : i32
    %33 = tpu.dynamic_rotate %32 by %c64_i32 dim 1 : vector<1x128xf32>, i32 -> vector<1x128xf32>
    %34 = arith.addf %32, %33 : vector<1x128xf32>
    %cst_6 = arith.constant 0.001953125 : f32
    %35 = vector.broadcast %cst_6 : f32 to vector<1x128xf32>
    %36 = arith.mulf %34, %35 : vector<1x128xf32>
    %37 = vector.broadcast %36 : vector<1x128xf32> to vector<40x128xf32>
    %38 = arith.subf %23, %37 : vector<40x128xf32>
    %39 = arith.mulf %38, %17 : vector<40x128xf32>
    %40 = arith.mulf %39, %39 : vector<40x128xf32>
    %cst_7 = arith.constant dense<0.000000e+00> : vector<128xf32>
    %41 = vector.multi_reduction <add>, %40, %cst_7 [0] : vector<40x128xf32> to vector<128xf32>
    %42 = vector.shape_cast %41 : vector<128xf32> to vector<1x128xf32>
    %c8_i32_8 = arith.constant 8 : i32
    %43 = tpu.dynamic_rotate %42 by %c8_i32_8 dim 1 : vector<1x128xf32>, i32 -> vector<1x128xf32>
    %44 = arith.addf %42, %43 : vector<1x128xf32>
    %c16_i32_9 = arith.constant 16 : i32
    %45 = tpu.dynamic_rotate %44 by %c16_i32_9 dim 1 : vector<1x128xf32>, i32 -> vector<1x128xf32>
    %46 = arith.addf %44, %45 : vector<1x128xf32>
    %c32_i32_10 = arith.constant 32 : i32
    %47 = tpu.dynamic_rotate %46 by %c32_i32_10 dim 1 : vector<1x128xf32>, i32 -> vector<1x128xf32>
    %48 = arith.addf %46, %47 : vector<1x128xf32>
    %c64_i32_11 = arith.constant 64 : i32
    %49 = tpu.dynamic_rotate %48 by %c64_i32_11 dim 1 : vector<1x128xf32>, i32 -> vector<1x128xf32>
    %50 = arith.addf %48, %49 : vector<1x128xf32>
    %cst_12 = arith.constant 0.001953125 : f32
    %51 = vector.broadcast %cst_12 : f32 to vector<1x128xf32>
    %52 = arith.mulf %50, %51 : vector<1x128xf32>
    %c0_13 = arith.constant 0 : index
    %c0_14 = arith.constant 0 : index
    %53 = vector.load %arg3[%c0_13, %c0_14] : memref<1x128xf32, #tpu.memory_space<vmem>>, vector<1x128xf32>
    %cst_15 = arith.constant 9.99999974E-6 : f32
    %54 = vector.broadcast %cst_15 : f32 to vector<1x128xf32>
    %55 = arith.addf %52, %54 : vector<1x128xf32>
    %56 = math.rsqrt %55 : vector<1x128xf32>
    %57 = arith.mulf %53, %56 : vector<1x128xf32>
    %58 = vector.broadcast %57 : vector<1x128xf32> to vector<40x128xf32>
    %59 = arith.mulf %39, %58 : vector<40x128xf32>
    %c0_16 = arith.constant 0 : index
    %c0_17 = arith.constant 0 : index
    %60 = vector.load %arg4[%c0_16, %c0_17] : memref<1x128xf32, #tpu.memory_space<vmem>>, vector<1x128xf32>
    %61 = vector.broadcast %60 : vector<1x128xf32> to vector<40x128xf32>
    %62 = arith.addf %59, %61 : vector<40x128xf32>
    %cst_18 = arith.constant 0.000000e+00 : f32
    %63 = vector.broadcast %cst_18 : f32 to vector<40x128xf32>
    %64 = arith.maximumf %62, %63 : vector<40x128xf32>
    %65 = arith.mulf %64, %17 : vector<40x128xf32>
    %c1_i32_19 = arith.constant 1 : i32
    %66 = tpu.dynamic_rotate %65 by %c1_i32_19 dim 0 : vector<40x128xf32>, i32 -> vector<40x128xf32>
    %c39_i32_20 = arith.constant 39 : i32
    %67 = tpu.dynamic_rotate %65 by %c39_i32_20 dim 0 : vector<40x128xf32>, i32 -> vector<40x128xf32>
    %68 = tpu.concatenate %66, %65, %67 in 1 : vector<40x128xf32>, vector<40x128xf32>, vector<40x128xf32> -> vector<40x384xf32>
    %69 = arith.truncf %68 : vector<40x384xf32> to vector<40x384xbf16>
    %c0_21 = arith.constant 0 : index
    %c0_22 = arith.constant 0 : index
    %70 = vector.load %arg2[%c0_21, %c0_22] : memref<384x128xbf16, #tpu.memory_space<vmem>>, vector<384x128xbf16>
    %cst_23 = arith.constant dense<0.000000e+00> : vector<40x128xf32>
    %71 = tpu.matmul %69, %70, %cst_23 {dimension_numbers = #tpu.dot_dimension_numbers<[1], [0], [0], [1], [0, 0, 1, 1], [], []>} : vector<40x384xbf16>, vector<384x128xbf16>, vector<40x128xf32> -> vector<40x128xf32>
    %72 = arith.mulf %71, %17 : vector<40x128xf32>
    %cst_24 = arith.constant dense<0.000000e+00> : vector<128xf32>
    %73 = vector.multi_reduction <add>, %72, %cst_24 [0] : vector<40x128xf32> to vector<128xf32>
    %74 = vector.shape_cast %73 : vector<128xf32> to vector<1x128xf32>
    %c8_i32_25 = arith.constant 8 : i32
    %75 = tpu.dynamic_rotate %74 by %c8_i32_25 dim 1 : vector<1x128xf32>, i32 -> vector<1x128xf32>
    %76 = arith.addf %74, %75 : vector<1x128xf32>
    %c16_i32_26 = arith.constant 16 : i32
    %77 = tpu.dynamic_rotate %76 by %c16_i32_26 dim 1 : vector<1x128xf32>, i32 -> vector<1x128xf32>
    %78 = arith.addf %76, %77 : vector<1x128xf32>
    %c32_i32_27 = arith.constant 32 : i32
    %79 = tpu.dynamic_rotate %78 by %c32_i32_27 dim 1 : vector<1x128xf32>, i32 -> vector<1x128xf32>
    %80 = arith.addf %78, %79 : vector<1x128xf32>
    %c64_i32_28 = arith.constant 64 : i32
    %81 = tpu.dynamic_rotate %80 by %c64_i32_28 dim 1 : vector<1x128xf32>, i32 -> vector<1x128xf32>
    %82 = arith.addf %80, %81 : vector<1x128xf32>
    %cst_29 = arith.constant 0.001953125 : f32
    %83 = vector.broadcast %cst_29 : f32 to vector<1x128xf32>
    %84 = arith.mulf %82, %83 : vector<1x128xf32>
    %85 = vector.broadcast %84 : vector<1x128xf32> to vector<40x128xf32>
    %86 = arith.subf %71, %85 : vector<40x128xf32>
    %87 = arith.mulf %86, %17 : vector<40x128xf32>
    %88 = arith.mulf %87, %87 : vector<40x128xf32>
    %cst_30 = arith.constant dense<0.000000e+00> : vector<128xf32>
    %89 = vector.multi_reduction <add>, %88, %cst_30 [0] : vector<40x128xf32> to vector<128xf32>
    %90 = vector.shape_cast %89 : vector<128xf32> to vector<1x128xf32>
    %c8_i32_31 = arith.constant 8 : i32
    %91 = tpu.dynamic_rotate %90 by %c8_i32_31 dim 1 : vector<1x128xf32>, i32 -> vector<1x128xf32>
    %92 = arith.addf %90, %91 : vector<1x128xf32>
    %c16_i32_32 = arith.constant 16 : i32
    %93 = tpu.dynamic_rotate %92 by %c16_i32_32 dim 1 : vector<1x128xf32>, i32 -> vector<1x128xf32>
    %94 = arith.addf %92, %93 : vector<1x128xf32>
    %c32_i32_33 = arith.constant 32 : i32
    %95 = tpu.dynamic_rotate %94 by %c32_i32_33 dim 1 : vector<1x128xf32>, i32 -> vector<1x128xf32>
    %96 = arith.addf %94, %95 : vector<1x128xf32>
    %c64_i32_34 = arith.constant 64 : i32
    %97 = tpu.dynamic_rotate %96 by %c64_i32_34 dim 1 : vector<1x128xf32>, i32 -> vector<1x128xf32>
    %98 = arith.addf %96, %97 : vector<1x128xf32>
    %cst_35 = arith.constant 0.001953125 : f32
    %99 = vector.broadcast %cst_35 : f32 to vector<1x128xf32>
    %100 = arith.mulf %98, %99 : vector<1x128xf32>
    %c0_36 = arith.constant 0 : index
    %c0_37 = arith.constant 0 : index
    %101 = vector.load %arg5[%c0_36, %c0_37] : memref<1x128xf32, #tpu.memory_space<vmem>>, vector<1x128xf32>
    %cst_38 = arith.constant 9.99999974E-6 : f32
    %102 = vector.broadcast %cst_38 : f32 to vector<1x128xf32>
    %103 = arith.addf %100, %102 : vector<1x128xf32>
    %104 = math.rsqrt %103 : vector<1x128xf32>
    %105 = arith.mulf %101, %104 : vector<1x128xf32>
    %106 = vector.broadcast %105 : vector<1x128xf32> to vector<40x128xf32>
    %107 = arith.mulf %87, %106 : vector<40x128xf32>
    %c0_39 = arith.constant 0 : index
    %c0_40 = arith.constant 0 : index
    %108 = vector.load %arg6[%c0_39, %c0_40] : memref<1x128xf32, #tpu.memory_space<vmem>>, vector<1x128xf32>
    %109 = vector.broadcast %108 : vector<1x128xf32> to vector<40x128xf32>
    %110 = arith.addf %107, %109 : vector<40x128xf32>
    %111 = arith.addf %110, %0 : vector<40x128xf32>
    %cst_41 = arith.constant 0.000000e+00 : f32
    %112 = vector.broadcast %cst_41 : f32 to vector<40x128xf32>
    %113 = arith.maximumf %111, %112 : vector<40x128xf32>
    %114 = arith.addf %113, %0 : vector<40x128xf32>
    %cst_42 = arith.constant 0.000000e+00 : f32
    %115 = vector.broadcast %cst_42 : f32 to vector<40x128xf32>
    %116 = arith.maximumf %114, %115 : vector<40x128xf32>
    %c0_43 = arith.constant 0 : index
    %c0_44 = arith.constant 0 : index
    %117 = vector.load %arg7[%c0_43, %c0_44] : memref<40x128xf32, #tpu.memory_space<vmem>>, vector<40x128xf32>
    tpu.vector_store %arg7[%c0_43, %c0_44], %116 {strides = array<i32>} : memref<40x128xf32, #tpu.memory_space<vmem>>, vector<40x128xf32>,
    return
  }
}

</mosaic_0001>

<bundles_post_ra>
// kernel: tpu_custom_call.1
= control target key start
LH: loop header
LB: loop body
LE: loop exit
PB: predicated region body
PF: predicated region fallthrough
CT: control target
= control target key end

     0   :  { %12 = vsyncpa [#allocation3], 0  ;;  %s1579_s0 = inlined_call_operand.hbm [shape: f32[40,128], index: 0, kind: input, shape index: {}]   ;;  %s1580_s1 = inlined_call_operand.hbm [shape: bf16[384,128], index: 1, kind: input, shape index: {}]   ;;  %s1581_s2 = inlined_call_operand.hbm [shape: bf16[384,128], index: 2, kind: input, shape index: {}]   ;;  %s1582_s3 = inlined_call_operand.vmem [shape: f32[1,128], index: 3, kind: input, shape index: {}]   ;;  %s1583_s4 = inlined_call_operand.vmem [shape: f32[1,128], index: 4, kind: input, shape index: {}]   ;;  %s1584_s5 = inlined_call_operand.vmem [shape: f32[1,128], index: 5, kind: input, shape index: {}]   ;;  %s1585_s6 = inlined_call_operand.vmem [shape: f32[1,128], index: 6, kind: input, shape index: {}]   ;;  %s1586_s7 = inlined_call_operand.hbm [shape: f32[40,128], index: 7, kind: output, shape index: {}]  }
   0x1   :  { %13 = vsyncpa [#allocation6], 0  ;;  %s32_s26 = sshll.u32 %s1580_s1, 4  ;;  %s33_s26 = int_to_ptr.hbm [resolvable:$true] %s32_s26 }
   0x2   :  { %14 = vsyncpa [#allocation4], 0  ;;  %s1349_s27 = smov [#allocation5]   ;;  %s19_s8 = sshll.u32 %s1579_s0, 4  ;;  %s20_s8 = int_to_ptr.hbm [resolvable:$true] %s19_s8 }
   0x3   :  { %s34_s28 = sshll.u32 %s1349_s27, 4  ;;  %s1350_s9 = smov 64   ;;  %s35_s28 = int_to_ptr.vmem [resolvable:$true] %s34_s28 }
   0x4   :  { %s1351_s10 = smov 4   ;;  %s1352_s11 = smov [#allocation2]  }
   0x5   :  { %40 = dma.hbm_to_vmem [thread:$0]  %s33_s26, 3072, %s35_s28, [#allocation6], %s1350_s9, %s1350_s9, %s1351_s10  }
   0x6   :  { %s21_s12 = sshll.u32 %s1352_s11, 4  ;;  %s1353_s13 = smov 128   ;;  %s22_s12 = int_to_ptr.vmem [resolvable:$true] %s21_s12 }
   0x7   :  { %s1354_s1 = smov 8   ;;  %s45_s16 = sshll.u32 %s1581_s2, 4  ;;  %s46_s16 = int_to_ptr.hbm [resolvable:$true] %s45_s16 }
   0x8   :  { %27 = dma.hbm_to_vmem [thread:$0]  %s20_s8, 640, %s22_s12, [#allocation3], %s1353_s13, %s1353_s13, %s1354_s1  }
   0x9   :  { %s1355_s0 = smov [#allocation7]  }
   0xa   :  { %s47_s17 = sshll.u32 %s1355_s0, 4  ;;  %s48_s17 = int_to_ptr.vmem [resolvable:$true] %s47_s17 }
   0xb   :  { %53 = dma.hbm_to_vmem [thread:$0]  %s46_s16, 3072, %s48_s17, [#allocation6], %s1350_s9, %s1350_s9, %s1351_s10  }
   0xc   :  { %1343 = dma.done.wait [#allocation3], 640  }
   0xd   :  { %1344 = vsyncadd [#allocation3], 4294966656 }
   0xe   :  { %1345 = dma.done.wait [#allocation6], 6144  }
   0xf   :  { %1346 = vsyncadd [#allocation6], 4294961152  ;;  %v1173_v0 = vld [vmem:[#allocation5 + $0x38] sm:$0xff]  ;;  %v1172_v2 = vld [vmem:[#allocation5 + $0x30] sm:$0xff]  ;;  %v79_v10 = vlaneseq  ;;  %s1357_s2 = smov 16   ;;  %s1358_s18 = smov 32  }
  0x10   :  { %v1181_v1 = vld [vmem:[#allocation5 + $0x78] sm:$0xff]  ;;  %1214 = vmatpush.bf16.msra.mxu2 %v1173_v0  ;;  %363 = vmatpush.bf16.msra.mxu0 %v1173_v0  ;;  %v1180_v3 = vld [vmem:[#allocation5 + $0x70] sm:$0xff]  ;;  %v1171_v4 = vld [vmem:[#allocation5 + $0x28] sm:$0xff]  ;;  %s957_s27 = sshll.u32 %s1586_s7, 4  ;;  %s958_s27 = int_to_ptr.hbm [resolvable:$true] %s957_s27 }
  0x11   :  { %1222 = vmatpush.bf16.msra.mxu3 %v1181_v1  ;;  %386 = vmatpush.bf16.msra.mxu1 %v1181_v1  ;;  %v1179_v5 = vld [vmem:[#allocation5 + $0x68] sm:$0xff]  ;;  %v1170_v6 = vld [vmem:[#allocation5 + $0x20] sm:$0xff]  ;;  %v1169_v8 = vld [vmem:[#allocation5 + $0x18] sm:$0xff]  ;;  %v1420_v15 = vshrl.u32 %v79_v10, 7 }
  0x12   :  { %v1178_v7 = vld [vmem:[#allocation5 + $0x60] sm:$0xff]  ;;  %v1177_v9 = vld [vmem:[#allocation5 + $0x58] sm:$0xff]  ;;  %v1168_v11 = vld [vmem:[#allocation5 + $0x10] sm:$0xff] }
  0x13   :  { %v1176_v12 = vld [vmem:[#allocation5 + $0x50] sm:$0xff]  ;;  %v1418_v14 = vld [vmem:[#allocation2 + $0x20] sm:$0xff]  ;;  %v1167_v16 = vld [vmem:[#allocation5 + $0x8] sm:$0xff]  ;;  %vm145_vm0 = vcmp.lt.s32.totalorder %v1420_v15, 1  ;;  %vm156_vm1 = vcmp.lt.s32.totalorder %v1420_v15, 7  ;;  %vm90_vm4 = vcmp.ge.s32.totalorder %v1420_v15, 1 }
  0x14   :  { %1215 = vmatpush.bf16.msra.mxu2 %v1172_v2  ;;  %364 = vmatpush.bf16.msra.mxu0 %v1172_v2  ;;  %v1416_v13 = vld [vmem:[#allocation2 + $0x18] sm:$0xff]  ;;  %v144_v18 = vrot.slane %v1418_v14, 7  ;;  %v1175_v19 = vld [vmem:[#allocation5 + $0x48] sm:$0xff]  ;;  %v1166_v20 = vld [vmem:[#allocation5] sm:$0xff]  ;;  %v169_v29 = vpack.c.bf16 %v1418_v14, %v1418_v14  ;;  %v155_v54 = vrot.slane %v1418_v14, 1 }
  0x15   :  { %1223 = vmatpush.bf16.msra.mxu3 %v1180_v3  ;;  %387 = vmatpush.bf16.msra.mxu1 %v1180_v3  ;;  %v143_v17 = vrot.slane %v1416_v13, 7  ;;  %v1189_v22 = vld [vmem:[#allocation5 + $0xb8] sm:$0xff]  ;;  %v1174_v23 = vld [vmem:[#allocation5 + $0x40] sm:$0xff]  ;;  %v1188_v30 = vld [vmem:[#allocation5 + $0xb0] sm:$0xff]  ;;  %v154_v53 = vrot.slane %v1416_v13, 1 }
  0x16   :  { %v1427_v24 = vld [vmem:[#allocation2] sm:$0xff]  ;;  %v1429_v25 = vld [vmem:[#allocation2 + $0x8] sm:$0xff]  ;;  %v1187_v35 = vld [vmem:[#allocation5 + $0xa8] sm:$0xff] }
  0x17   :  { %v146_v21 = vsel %vm145_vm0, %v143_v17, %v144_v18  ;;  %v140_v27 = vrot.slane %v1427_v24, 7  ;;  %v141_v28 = vrot.slane %v1429_v25, 7  ;;  %v163_v33 = vpack.c.bf16 %v1429_v25, %v1427_v24  ;;  %v1186_v36 = vld [vmem:[#allocation5 + $0xa0] sm:$0xff]  ;;  %v1185_v37 = vld [vmem:[#allocation5 + $0x98] sm:$0xff]  ;;  %v1441_v38 = vld [vmem:[#allocation2 + $0x10] sm:$0xff] }
  0x18   :  { %1216 = vmatpush.bf16.msra.mxu2 %v1171_v4  ;;  %365 = vmatpush.bf16.msra.mxu0 %v1171_v4  ;;  %v168_v26 = vpack.c.bf16 %v146_v21, %v146_v21  ;;  %v142_v39 = vrot.slane %v1441_v38, 7  ;;  %v1184_v40 = vld [vmem:[#allocation5 + $0x90] sm:$0xff]  ;;  %v166_v43 = vpack.c.bf16 %v1416_v13, %v1441_v38  ;;  %v1183_v45 = vld [vmem:[#allocation5 + $0x88] sm:$0xff]  ;;  %v151_v46 = vrot.slane %v1427_v24, 1  ;;  %v1182_v49 = vld [vmem:[#allocation5 + $0x80] sm:$0xff] }
  0x19   :  { %1224 = vmatpush.bf16.msra.mxu3 %v1179_v5  ;;  %388 = vmatpush.bf16.msra.mxu1 %v1179_v5  ;;  %v149_v31 = vsel %vm145_vm0, %v140_v27, %v141_v28  ;;  %v150_v32 = vsel %vm145_vm0, %v144_v18, %v140_v27  ;;  %v152_v47 = vrot.slane %v1429_v25, 1  ;;  %v153_v48 = vrot.slane %v1441_v38, 1 }
  0x1a   :  { %v162_v34 = vpack.c.bf16 %v149_v31, %v150_v32  ;;  %v147_v41 = vsel %vm145_vm0, %v142_v39, %v143_v17  ;;  %v148_v42 = vsel %vm145_vm0, %v141_v28, %v142_v39  ;;  %v157_v55 = vsel %vm156_vm1, %v154_v53, %v155_v54 }
  0x1b   :  { %v165_v44 = vpack.c.bf16 %v147_v41, %v148_v42  ;;  %v159_v50 = vsel %vm156_vm1, %v152_v47, %v153_v48  ;;  %v160_v51 = vsel %vm156_vm1, %v151_v46, %v152_v47  ;;  %v158_v56 = vsel %vm156_vm1, %v153_v48, %v154_v53 }
  0x1c   :  { %1217 = vmatpush.bf16.msra.mxu2 %v1170_v6  ;;  %366 = vmatpush.bf16.msra.mxu0 %v1170_v6  ;;  %v164_v52 = vpack.c.bf16 %v159_v50, %v160_v51  ;;  %v167_v57 = vpack.c.bf16 %v157_v55, %v158_v56  ;;  %v161_v58 = vsel %vm156_vm1, %v155_v54, %v151_v46  ;;  %v84_v21 = vadd.s32 32, %v1420_v15 }
  0x1d   :  { %1225 = vmatpush.bf16.msra.mxu3 %v1178_v7  ;;  %389 = vmatpush.bf16.msra.mxu1 %v1178_v7  ;;  %v170_v59 = vpack.c.bf16 %v161_v58, %v161_v58 }
  0x1e   :  { %vm119_vm6 = vcmp.le.s32.totalorder %v84_v21, 34 }
  0x20   :  { %1218 = vmatpush.bf16.msra.mxu2 %v1169_v8  ;;  %367 = vmatpush.bf16.msra.mxu0 %v1169_v8  ;;  %v82_v8 = vadd.s32 16, %v1420_v15 }
  0x21   :  { %1226 = vmatpush.bf16.msra.mxu3 %v1177_v9  ;;  %390 = vmatpush.bf16.msra.mxu1 %v1177_v9 }
  0x22   :  { %vm97_vm2 = vcmp.le.s32.totalorder %v82_v8, 16  ;;  %vm112_vm3 = vcmp.ge.s32.totalorder %v82_v8, 19 }
  0x23   :  { %vm127_vm5 = vmor %vm97_vm2, %vm112_vm3 }
  0x24   :  { %1219 = vmatpush.bf16.msra.mxu2 %v1168_v11  ;;  %368 = vmatpush.bf16.msra.mxu0 %v1168_v11 }
  0x25   :  { %1227 = vmatpush.bf16.msra.mxu3 %v1176_v12  ;;  %391 = vmatpush.bf16.msra.mxu1 %v1176_v12 }
  0x28   :  { %1220 = vmatpush.bf16.msra.mxu2 %v1167_v16  ;;  %369 = vmatpush.bf16.msra.mxu0 %v1167_v16 }
  0x29   :  { %1228 = vmatpush.bf16.msra.mxu3 %v1175_v19  ;;  %392 = vmatpush.bf16.msra.mxu1 %v1175_v19 }
  0x2c   :  { %1221 = vmatpush.bf16.msra.mxu2 %v1166_v20  ;;  %370 = vmatpush.bf16.msra.mxu0 %v1166_v20 }
  0x2d   :  { %1229 = vmatpush.bf16.msra.mxu3 %v1174_v23  ;;  %393 = vmatpush.bf16.msra.mxu1 %v1174_v23 }
  0x2f   :  { %381 = vmatmul.bf16.vlgmr.msra.gmra.mxu2 %v168_v26  ;;  %371 = vmatmul.bf16.vlgmr.msra.gmra.mxu0 %v162_v34 }
  0x30   :  { %409 = vmatpush.bf16.msrb.mxu2 %v1189_v22  ;;  %404 = vmatmul.bf16.vlgmr.msra.gmra.mxu3 %v169_v29  ;;  %v1356_v22 = vmov 0.0  }
  0x31   :  { %394 = vmatmul.bf16.vlgmr.msra.gmra.mxu1 %v163_v33  ;;  %v1469_v23 = vsel %vm90_vm4, 1.0, %v1356_v22  ;;  %v1471_v26 = vsel %vm127_vm5, 1.0, %v1356_v22  ;;  %v1475_v34 = vsel %vm119_vm6, 1.0, %v1356_v22 }
  0x34   :  { %410 = vmatpush.bf16.msrb.mxu2 %v1188_v30 }
  0x38   :  { %411 = vmatpush.bf16.msrb.mxu2 %v1187_v35 }
  0x3c   :  { %412 = vmatpush.bf16.msrb.mxu2 %v1186_v36 }
  0x3f   :  { %376 = vmatmul.bf16.gmra.mxu0 %v165_v44 }
  0x40   :  { %413 = vmatpush.bf16.msrb.mxu2 %v1185_v37 }
  0x41   :  { %399 = vmatmul.bf16.gmra.mxu1 %v166_v43 }
  0x44   :  { %414 = vmatpush.bf16.msrb.mxu2 %v1184_v40 }
  0x48   :  { %415 = vmatpush.bf16.msrb.mxu2 %v1183_v45 }
  0x4c   :  { %416 = vmatpush.bf16.msrb.mxu2 %v1182_v49 }
  0x4f   :  { %417 = vmatmul.bf16.vlgmr.msrb.gmra.mxu2 %v164_v52 }
  0x5f   :  { %422 = vmatmul.bf16.gmra.mxu2 %v167_v57 }
  0x6f   :  { %427 = vmatmul.bf16.gmra.mxu2 %v170_v59 }
  0xac   :  { %v372_v0 = vpop.f32.mrf.mxu0 }
  0xae   :  { %v395_v1 = vpop.f32.mrf.mxu1 }
  0xaf   :  { %v396_v10 = vadd.f32 %v395_v1, %v372_v0 }
  0xb2   :  { %v382_v60 = vpop.f32.mrf.mxu2 }
  0xb3   :  { %v405_v61 = vpop.f32.mrf.mxu3 }
  0xb4   :  { %v374_v3 = vpop.f32.mrf.mxu0  ;;  %v406_v31 = vadd.f32 %v405_v61, %v382_v60 }
  0xb6   :  { %v397_v4 = vpop.f32.mrf.mxu1 }
  0xb7   :  { %v398_v12 = vadd.f32 %v397_v4, %v374_v3 }
  0xba   :  { %v384_v62 = vpop.f32.mrf.mxu2 }
  0xbb   :  { %v407_v63 = vpop.f32.mrf.mxu3 }
  0xbc   :  { %v377_v6 = vpop.f32.mrf.mxu0 }
  0xbe   :  { %v400_v7 = vpop.f32.mrf.mxu1 }
  0xbf   :  { %v401_v11 = vadd.f32 %v400_v7, %v377_v6 }
  0xc4   :  { %v379_v16 = vpop.f32.mrf.mxu0 }
  0xc6   :  { %v402_v17 = vpop.f32.mrf.mxu1 }
  0xc7   :  { %v403_v28 = vadd.f32 %v402_v17, %v379_v16 }
  0xd2   :  { %v418_v2 = vpop.f32.mrf.mxu2 }
  0xd3   :  { %v419_v19 = vadd.f32 %v418_v2, %v396_v10 }
  0xd5   :  { %v432_v29 = vmul.f32 %v1469_v23, %v419_v19 }
  0xda   :  { %v420_v5 = vpop.f32.mrf.mxu2 }
  0xdb   :  { %v421_v27 = vadd.f32 %v420_v5, %v398_v12 }
  0xdd   :  { %v437_v32 = vadd.f32 %v432_v29, %v421_v27 }
  0xe2   :  { %v423_v9 = vpop.f32.mrf.mxu2 }
  0xe3   :  { %v424_v20 = vadd.f32 %v423_v9, %v401_v11 }
  0xe5   :  { %v434_v30 = vmul.f32 %v1471_v26, %v424_v20 }
  0xe7   :  { %v438_v36 = vadd.f32 %v437_v32, %v434_v30  ;;  %v1197_v32 = vld [vmem:[#allocation7 + $0x38] sm:$0xff] }
  0xe8   :  { %760 = vmatpush.bf16.msrb.mxu3 %v1197_v32 }
  0xea   :  { %v425_v18 = vpop.f32.mrf.mxu2 }
  0xeb   :  { %v426_v33 = vadd.f32 %v425_v18, %v403_v28 }
  0xed   :  { %v439_v39 = vadd.f32 %v438_v36, %v426_v33  ;;  %v1196_v36 = vld [vmem:[#allocation7 + $0x30] sm:$0xff] }
  0xee   :  { %761 = vmatpush.bf16.msrb.mxu3 %v1196_v36 }
  0xf2   :  { %v428_v35 = vpop.f32.mrf.mxu2 }
  0xf3   :  { %v429_v37 = vadd.f32 %v428_v35, %v406_v31  ;;  %v1205_v31 = vld [vmem:[#allocation7 + $0x78] sm:$0xff]  ;;  %v1204_v35 = vld [vmem:[#allocation7 + $0x70] sm:$0xff] }
  0xf4   :  { %783 = vmatpush.bf16.msrb.mxu0 %v1205_v31 }
  0xf5   :  { %v436_v40 = vmul.f32 %v1475_v34, %v429_v37 }
  0xf7   :  { %v440_v41 = vadd.f32 %v439_v39, %v436_v40  ;;  %v1203_v39 = vld [vmem:[#allocation7 + $0x68] sm:$0xff] }
  0xf8   :  { %784 = vmatpush.bf16.msrb.mxu0 %v1204_v35  ;;  %v1195_v40 = vld [vmem:[#allocation7 + $0x28] sm:$0xff] }
  0xf9   :  { %v441_v42 = vrot.slane %v440_v41, 4  ;;  %762 = vmatpush.bf16.msrb.mxu3 %v1195_v40 }
  0xfa   :  { %v430_v43 = vpop.f32.mrf.mxu2 }
  0xfb   :  { %v442_v44 = vadd.f32 %v441_v42, %v440_v41  ;;  %v1211_v41 = vld [vmem:[#allocation7 + $0xa8] sm:$0xff]  ;;  %v1202_v42 = vld [vmem:[#allocation7 + $0x60] sm:$0xff] }
  0xfc   :  { %785 = vmatpush.bf16.msrb.mxu0 %v1203_v39  ;;  %v1194_v43 = vld [vmem:[#allocation7 + $0x20] sm:$0xff] }
  0xfd   :  { %v443_v45 = vrot.slane %v442_v44, 2  ;;  %763 = vmatpush.bf16.msrb.mxu3 %v1194_v43 }
  0xff   :  { %v444_v46 = vadd.f32 %v443_v45, %v442_v44  ;;  %v1210_v44 = vld [vmem:[#allocation7 + $0xa0] sm:$0xff]  ;;  %v1201_v45 = vld [vmem:[#allocation7 + $0x58] sm:$0xff] }
 0x100   :  { %786 = vmatpush.bf16.msrb.mxu0 %v1202_v42 }
 0x101   :  { %v445_v47 = vrot.slane %v444_v46, 1 }
 0x103   :  { %v446_v48 = vadd.f32 %v445_v47, %v444_v46  ;;  %v1193_v46 = vld [vmem:[#allocation7 + $0x18] sm:$0xff] }
 0x104   :  { %787 = vmatpush.bf16.msrb.mxu0 %v1201_v45  ;;  %v1209_v47 = vld [vmem:[#allocation7 + $0x98] sm:$0xff]  ;;  %764 = vmatpush.bf16.msrb.mxu3 %v1193_v46 }
 0x105   :  { %447 = vrot.lane.b32.xlu0 %v446_v48, %s1354_s1 }
 0x177   :  { %v448_v49 = vpop.permute.xlu0 %447 }
 0x178   :  { %v449_v50 = vadd.f32 %v448_v49, %v446_v48  ;;  %v1200_v48 = vld [vmem:[#allocation7 + $0x50] sm:$0xff] }
 0x179   :  { %v1192_v49 = vld [vmem:[#allocation7 + $0x10] sm:$0xff]  ;;  %788 = vmatpush.bf16.msrb.mxu0 %v1200_v48 }
 0x17a   :  { %450 = vrot.lane.b32.xlu0 %v449_v50, %s1357_s2  ;;  %765 = vmatpush.bf16.msrb.mxu3 %v1192_v49 }
 0x1ec   :  { %v451_v51 = vpop.permute.xlu0 %450 }
 0x1ed   :  { %v452_v52 = vadd.f32 %v451_v51, %v449_v50  ;;  %v1208_v50 = vld [vmem:[#allocation7 + $0x90] sm:$0xff]  ;;  %v1199_v51 = vld [vmem:[#allocation7 + $0x48] sm:$0xff] }
 0x1ee   :  { %789 = vmatpush.bf16.msrb.mxu0 %v1199_v51 }
 0x1ef   :  { %453 = vrot.lane.b32.xlu1 %v452_v52, %s1358_s18 }
 0x261   :  { %v454_v53 = vpop.permute.xlu1 %453 }
 0x262   :  { %v455_v54 = vadd.f32 %v454_v53, %v452_v52  ;;  %v1191_v53 = vld [vmem:[#allocation7 + $0x8] sm:$0xff] }
 0x263   :  { %766 = vmatpush.bf16.msrb.mxu3 %v1191_v53 }
 0x264   :  { %456 = vrot.lane.b32.xlu1 %v455_v54, %s1350_s9 }
 0x2d6   :  { %v457_v55 = vpop.permute.xlu1 %456 }
 0x2d7   :  { %v458_v56 = vadd.f32 %v457_v55, %v455_v54  ;;  %v1207_v54 = vld [vmem:[#allocation7 + $0x88] sm:$0xff] }
 0x2d9   :  { %v459_v57 = vmul.f32 0.001953125, %v458_v56  ;;  %v1198_v56 = vld [vmem:[#allocation7 + $0x40] sm:$0xff] }
 0x2da   :  { %790 = vmatpush.bf16.msrb.mxu0 %v1198_v56 }
 0x2db   :  { %v460_v58 = vperm.slane %v459_v57, 0 }
 0x2dd   :  { %v461_v59 = vsub.f32 %v419_v19, %v460_v58  ;;  %v1482_v60 = vsub.f32 %v421_v27, %v460_v58  ;;  %v463_v61 = vsub.f32 %v424_v20, %v460_v58  ;;  %v465_v63 = vsub.f32 %v429_v37, %v460_v58  ;;  %v1212_v37 = vld [vmem:[#allocation7 + $0xb0] sm:$0xff] }
 0x2de   :  { %v1490_v1 = vsub.f32 %v426_v33, %v460_v58  ;;  %v1213_v33 = vld [vmem:[#allocation7 + $0xb8] sm:$0xff]  ;;  %v1190_v58 = vld [vmem:[#allocation7] sm:$0xff] }
 0x2df   :  { %v1485_v62 = vmul.f32 %v1469_v23, %v461_v59  ;;  %v1488_v0 = vmul.f32 %v1471_v26, %v463_v61  ;;  %v472_v3 = vmul.f32 %v1482_v60, %v1482_v60  ;;  %v1497_v4 = vmul.f32 %v1475_v34, %v465_v63  ;;  %806 = vmatpush.bf16.msrb.mxu1 %v1213_v33  ;;  %v1206_v61 = vld [vmem:[#allocation7 + $0x80] sm:$0xff] }
 0x2e0   :  { %v474_v7 = vmul.f32 %v1490_v1, %v1490_v1  ;;  %767 = vmatpush.bf16.msrb.mxu3 %v1190_v58 }
 0x2e1   :  { %v471_v2 = vmul.f32 %v1485_v62, %v1485_v62  ;;  %v473_v5 = vmul.f32 %v1488_v0, %v1488_v0  ;;  %v475_v9 = vmul.f32 %v1497_v4, %v1497_v4 }
 0x2e3   :  { %v476_v6 = vadd.f32 %v472_v3, %v471_v2  ;;  %807 = vmatpush.bf16.msrb.mxu1 %v1212_v37 }
 0x2e5   :  { %v477_v8 = vadd.f32 %v476_v6, %v473_v5 }
 0x2e7   :  { %v478_v10 = vadd.f32 %v477_v8, %v474_v7  ;;  %808 = vmatpush.bf16.msrb.mxu1 %v1211_v41  ;;  %v499_v7 = vld [vmem:[%s1582_s3] sm:$0x1] }
 0x2e9   :  { %v479_v11 = vadd.f32 %v478_v10, %v475_v9 }
 0x2eb   :  { %v480_v12 = vrot.slane %v479_v11, 4  ;;  %809 = vmatpush.bf16.msrb.mxu1 %v1210_v44 }
 0x2ed   :  { %v481_v16 = vadd.f32 %v480_v12, %v479_v11  ;;  %v1241_v12 = vld [vmem:[%s1583_s4] ss:$0 sm:$0xff] }
 0x2ef   :  { %v482_v17 = vrot.slane %v481_v16, 2  ;;  %810 = vmatpush.bf16.msrb.mxu1 %v1209_v47 }
 0x2f1   :  { %v483_v18 = vadd.f32 %v482_v17, %v481_v16 }
 0x2f3   :  { %v484_v19 = vrot.slane %v483_v18, 1  ;;  %811 = vmatpush.bf16.msrb.mxu1 %v1208_v50 }
 0x2f5   :  { %v485_v20 = vadd.f32 %v484_v19, %v483_v18 }
 0x2f7   :  { %486 = vrot.lane.b32.xlu2 %v485_v20, %s1354_s1  ;;  %812 = vmatpush.bf16.msrb.mxu1 %v1207_v54 }
 0x2fb   :  { %813 = vmatpush.bf16.msrb.mxu1 %v1206_v61 }
 0x351   :  { %v487_v21 = vpop.permute.xlu2 %486 }
 0x352   :  { %v488_v22 = vadd.f32 %v487_v21, %v485_v20 }
 0x354   :  { %489 = vrot.lane.b32.xlu2 %v488_v22, %s1357_s2 }
 0x3ae   :  { %v490_v27 = vpop.permute.xlu2 %489 }
 0x3af   :  { %v491_v28 = vadd.f32 %v490_v27, %v488_v22 }
 0x3b1   :  { %492 = vrot.lane.b32.xlu0 %v491_v28, %s1358_s18 }
 0x423   :  { %v493_v29 = vpop.permute.xlu0 %492 }
 0x424   :  { %v494_v30 = vadd.f32 %v493_v29, %v491_v28 }
 0x426   :  { %495 = vrot.lane.b32.xlu1 %v494_v30, %s1350_s9 }
 0x498   :  { %v496_v52 = vpop.permute.xlu1 %495 }
 0x499   :  { %v497_v55 = vadd.f32 %v496_v52, %v494_v30 }
 0x49b   :  { %v498_v57 = vmul.f32 0.001953125, %v497_v55 }
 0x49d   :  { %v500_v59 = vadd.f32 1e-05, %v498_v57 }
 0x49f   :  { %1243 = vrsqrt.f32 %v500_v59  ;;  %vm507_vm8 = vweird.f32 %v500_v59 }
 0x4a5   :  { %v1244_v63 = vpop.eup %1243 }
 0x4a6   :  { %v502_v2 = vmul.f32 %v1244_v63, %v500_v59  ;;  %vm508_vm7 = vweird.f32 %v1244_v63 }
 0x4a7   :  { %vm509_vm9 = vmor %vm507_vm8, %vm508_vm7 }
 0x4a8   :  { %v503_v3 = vmul.f32 %v1244_v63, %v502_v2 }
 0x4aa   :  { %v504_v5 = vmul.f32 0.5, %v503_v3 }
 0x4ac   :  { %v505_v6 = vsub.f32 1.5, %v504_v5 }
 0x4ae   :  { %v506_v8 = vmul.f32 %v1244_v63, %v505_v6 }
 0x4b0   :  { %v510_v9 = vsel %vm509_vm9, %v1244_v63, %v506_v8 }
 0x4b1   :  { %v511_v10 = vmul.f32 %v510_v9, %v499_v7 }
 0x4b3   :  { %v513_v11 = vperm.slane %v511_v10, 0 }
 0x4b5   :  { %v515_v16 = vmul.f32 %v513_v11, %v1485_v62  ;;  %v516_v17 = vmul.f32 %v513_v11, %v1482_v60  ;;  %v519_v18 = vmul.f32 %v513_v11, %v1497_v4  ;;  %v517_v19 = vmul.f32 %v513_v11, %v1488_v0 }
 0x4b6   :  { %v518_v43 = vmul.f32 %v513_v11, %v1490_v1 }
 0x4b7   :  { %v524_v20 = vadd.f32 %v1241_v12, %v515_v16  ;;  %v525_v21 = vadd.f32 %v1241_v12, %v516_v17  ;;  %v528_v22 = vadd.f32 %v1241_v12, %v519_v18  ;;  %v526_v27 = vadd.f32 %v1241_v12, %v517_v19 }
 0x4b8   :  { %v527_v47 = vadd.f32 %v1241_v12, %v518_v43 }
 0x4b9   :  { %v529_v28 = vmax.f32 %v524_v20, 0.0  ;;  %v530_v29 = vmax.f32 %v525_v21, 0.0  ;;  %v533_v30 = vmax.f32 %v528_v22, 0.0  ;;  %v531_v31 = vmax.f32 %v526_v27, 0.0 }
 0x4ba   :  { %v532_v48 = vmax.f32 %v527_v47, 0.0 }
 0x4bb   :  { %v534_v32 = vmul.f32 %v1469_v23, %v529_v28  ;;  %v538_v33 = vmul.f32 %v1475_v34, %v533_v30  ;;  %v536_v62 = vmul.f32 %v1471_v26, %v531_v31  ;;  %v540_v35 = vrot.slane %v530_v29, 7 }
 0x4bc   :  { %v550_v60 = vrot.slane %v530_v29, 1  ;;  %v542_v51 = vrot.slane %v532_v48, 7  ;;  %v552_v52 = vrot.slane %v532_v48, 1 }
 0x4bd   :  { %v560_v36 = vpack.c.bf16 %v530_v29, %v534_v32  ;;  %v539_v4 = vrot.slane %v534_v32, 7  ;;  %v543_v37 = vrot.slane %v538_v33, 7  ;;  %v549_v0 = vrot.slane %v534_v32, 1 }
 0x4be   :  { %v551_v39 = vrot.slane %v536_v62, 1  ;;  %v541_v49 = vrot.slane %v536_v62, 7  ;;  %v553_v50 = vrot.slane %v538_v33, 1  ;;  %v563_v53 = vpack.c.bf16 %v532_v48, %v536_v62 }
 0x4bf   :  { %791 = vmatmul.bf16.vlgmr.msrb.gmra.mxu0 %v560_v36  ;;  %v547_v40 = vsel %vm145_vm0, %v539_v4, %v540_v35  ;;  %v548_v41 = vsel %vm145_vm0, %v543_v37, %v539_v4  ;;  %v557_v42 = vsel %vm156_vm1, %v549_v0, %v550_v60  ;;  %v566_v59 = vpack.c.bf16 %v538_v33, %v538_v33 }
 0x4c0   :  { %v559_v44 = vpack.c.bf16 %v547_v40, %v548_v41  ;;  %v556_v45 = vsel %vm156_vm1, %v550_v60, %v551_v39  ;;  %v545_v54 = vsel %vm145_vm0, %v541_v49, %v542_v51  ;;  %v546_v1 = vsel %vm145_vm0, %v540_v35, %v541_v49 }
 0x4c1   :  { %v561_v46 = vpack.c.bf16 %v556_v45, %v557_v42  ;;  %v554_v55 = vsel %vm156_vm1, %v552_v52, %v553_v50  ;;  %v555_v56 = vsel %vm156_vm1, %v551_v39, %v552_v52  ;;  %v562_v57 = vpack.c.bf16 %v545_v54, %v546_v1 }
 0x4c2   :  { %768 = vmatmul.bf16.vlgmr.msrb.gmra.mxu3 %v559_v44  ;;  %v564_v58 = vpack.c.bf16 %v554_v55, %v555_v56  ;;  %v544_v61 = vsel %vm145_vm0, %v542_v51, %v543_v37  ;;  %v558_v63 = vsel %vm156_vm1, %v553_v50, %v549_v0 }
 0x4c3   :  { %814 = vmatmul.bf16.vlgmr.msrb.gmra.mxu1 %v561_v46  ;;  %v565_v2 = vpack.c.bf16 %v544_v61, %v544_v61  ;;  %v567_v3 = vpack.c.bf16 %v558_v63, %v558_v63 }
 0x4cf   :  { %796 = vmatmul.bf16.gmra.mxu0 %v563_v53 }
 0x4d2   :  { %773 = vmatmul.bf16.gmra.mxu3 %v562_v57 }
 0x4d3   :  { %819 = vmatmul.bf16.gmra.mxu1 %v564_v58 }
 0x4df   :  { %801 = vmatmul.bf16.gmra.mxu0 %v566_v59 }
 0x4e2   :  { %778 = vmatmul.bf16.gmra.mxu3 %v565_v2 }
 0x4e3   :  { %824 = vmatmul.bf16.gmra.mxu1 %v567_v3 }
 0x53c   :  { %v792_v5 = vpop.f32.mrf.mxu0 }
 0x540   :  { %v815_v6 = vpop.f32.mrf.mxu1 }
 0x544   :  { %v794_v7 = vpop.f32.mrf.mxu0 }
 0x545   :  { %v769_v8 = vpop.f32.mrf.mxu3 }
 0x546   :  { %v793_v19 = vadd.f32 %v792_v5, %v769_v8 }
 0x548   :  { %v817_v9 = vpop.f32.mrf.mxu1  ;;  %v816_v27 = vadd.f32 %v815_v6, %v793_v19 }
 0x54a   :  { %v829_v32 = vmul.f32 %v1469_v23, %v816_v27 }
 0x54c   :  { %v797_v10 = vpop.f32.mrf.mxu0 }
 0x54d   :  { %v771_v11 = vpop.f32.mrf.mxu3 }
 0x54e   :  { %v795_v22 = vadd.f32 %v794_v7, %v771_v11 }
 0x550   :  { %v820_v12 = vpop.f32.mrf.mxu1  ;;  %v818_v30 = vadd.f32 %v817_v9, %v795_v22 }
 0x552   :  { %v834_v60 = vadd.f32 %v829_v32, %v818_v30 }
 0x554   :  { %v799_v16 = vpop.f32.mrf.mxu0 }
 0x555   :  { %v774_v17 = vpop.f32.mrf.mxu3 }
 0x556   :  { %v798_v20 = vadd.f32 %v797_v10, %v774_v17 }
 0x558   :  { %v822_v18 = vpop.f32.mrf.mxu1  ;;  %v821_v28 = vadd.f32 %v820_v12, %v798_v20 }
 0x55a   :  { %v831_v33 = vmul.f32 %v1471_v26, %v821_v28 }
 0x55c   :  { %v802_v15 = vpop.f32.mrf.mxu0  ;;  %v835_v37 = vadd.f32 %v834_v60, %v831_v33 }
 0x55d   :  { %v776_v21 = vpop.f32.mrf.mxu3 }
 0x55e   :  { %v800_v31 = vadd.f32 %v799_v16, %v776_v21 }
 0x560   :  { %v825_v29 = vpop.f32.mrf.mxu1  ;;  %v823_v36 = vadd.f32 %v822_v18, %v800_v31 }
 0x562   :  { %v836_v40 = vadd.f32 %v835_v37, %v823_v36 }
 0x564   :  { %v804_v62 = vpop.f32.mrf.mxu0 }
 0x565   :  { %v779_v35 = vpop.f32.mrf.mxu3 }
 0x566   :  { %v803_v4 = vadd.f32 %v802_v15, %v779_v35 }
 0x568   :  { %v826_v0 = vadd.f32 %v825_v29, %v803_v4  ;;  %v827_v39 = vpop.f32.mrf.mxu1 }
 0x569   :  { %v896_v39 = vld [vmem:[%s1584_s5] sm:$0x1]  ;;  %s1359_s5 = smov [#allocation8]  }
 0x56a   :  { %v833_v41 = vmul.f32 %v1475_v34, %v826_v0 }
 0x56c   :  { %v837_v42 = vadd.f32 %v836_v40, %v833_v41 }
 0x56d   :  { %v781_v43 = vpop.f32.mrf.mxu3 }
 0x56e   :  { %v838_v44 = vrot.slane %v837_v42, 4 }
 0x570   :  { %v839_v45 = vadd.f32 %v838_v44, %v837_v42  ;;  %v1242_v44 = vld [vmem:[%s1585_s6] ss:$0 sm:$0xff]  ;;  %s955_s6 = sshll.u32 %s1359_s5, 4  ;;  %s956_s6 = int_to_ptr.vmem [resolvable:$true] %s955_s6 }
 0x572   :  { %v840_v46 = vrot.slane %v839_v45, 2 }
 0x574   :  { %v841_v47 = vadd.f32 %v840_v46, %v839_v45 }
 0x576   :  { %v842_v48 = vrot.slane %v841_v47, 1 }
 0x578   :  { %v843_v49 = vadd.f32 %v842_v48, %v841_v47 }
 0x57a   :  { %844 = vrot.lane.b32.xlu2 %v843_v49, %s1354_s1 }
 0x5d4   :  { %v845_v50 = vpop.permute.xlu2 %844 }
 0x5d5   :  { %v846_v51 = vadd.f32 %v845_v50, %v843_v49 }
 0x5d7   :  { %847 = vrot.lane.b32.xlu0 %v846_v51, %s1357_s2 }
 0x649   :  { %v848_v52 = vpop.permute.xlu0 %847 }
 0x64a   :  { %v849_v53 = vadd.f32 %v848_v52, %v846_v51 }
 0x64c   :  { %850 = vrot.lane.b32.xlu1 %v849_v53, %s1358_s18 }
 0x6be   :  { %v851_v54 = vpop.permute.xlu1 %850 }
 0x6bf   :  { %v852_v1 = vadd.f32 %v851_v54, %v849_v53 }
 0x6c1   :  { %853 = vrot.lane.b32.xlu2 %v852_v1, %s1350_s9 }
 0x71b   :  { %v854_v55 = vpop.permute.xlu2 %853 }
 0x71c   :  { %v855_v56 = vadd.f32 %v854_v55, %v852_v1 }
 0x71e   :  { %v856_v57 = vmul.f32 0.001953125, %v855_v56 }
 0x720   :  { %v857_v58 = vperm.slane %v856_v57, 0 }
 0x722   :  { %v858_v59 = vsub.f32 %v816_v27, %v857_v58  ;;  %v859_v61 = vsub.f32 %v818_v30, %v857_v58  ;;  %v860_v63 = vsub.f32 %v821_v28, %v857_v58  ;;  %v862_v3 = vsub.f32 %v826_v0, %v857_v58 }
 0x723   :  { %v861_v6 = vsub.f32 %v823_v36, %v857_v58 }
 0x724   :  { %v863_v2 = vmul.f32 %v1469_v23, %v858_v59  ;;  %v865_v5 = vmul.f32 %v1471_v26, %v860_v63  ;;  %v869_v8 = vmul.f32 %v859_v61, %v859_v61  ;;  %v867_v9 = vmul.f32 %v1475_v34, %v862_v3 }
 0x725   :  { %v871_v12 = vmul.f32 %v861_v6, %v861_v6 }
 0x726   :  { %v868_v7 = vmul.f32 %v863_v2, %v863_v2  ;;  %v870_v10 = vmul.f32 %v865_v5, %v865_v5  ;;  %v872_v17 = vmul.f32 %v867_v9, %v867_v9 }
 0x728   :  { %v873_v11 = vadd.f32 %v869_v8, %v868_v7 }
 0x72a   :  { %v874_v16 = vadd.f32 %v873_v11, %v870_v10 }
 0x72c   :  { %v875_v18 = vadd.f32 %v874_v16, %v871_v12 }
 0x72e   :  { %v876_v19 = vadd.f32 %v875_v18, %v872_v17 }
 0x730   :  { %v877_v20 = vrot.slane %v876_v19, 4 }
 0x732   :  { %v878_v15 = vadd.f32 %v877_v20, %v876_v19 }
 0x734   :  { %v879_v21 = vrot.slane %v878_v15, 2 }
 0x736   :  { %v880_v22 = vadd.f32 %v879_v21, %v878_v15 }
 0x738   :  { %v881_v23 = vrot.slane %v880_v22, 1 }
 0x73a   :  { %v882_v27 = vadd.f32 %v881_v23, %v880_v22 }
 0x73c   :  { %883 = vrot.lane.b32.xlu0 %v882_v27, %s1354_s1 }
 0x7ae   :  { %v884_v26 = vpop.permute.xlu0 %883 }
 0x7af   :  { %v885_v28 = vadd.f32 %v884_v26, %v882_v27 }
 0x7b1   :  { %886 = vrot.lane.b32.xlu1 %v885_v28, %s1357_s2 }
 0x823   :  { %v887_v34 = vpop.permute.xlu1 %886 }
 0x824   :  { %v888_v29 = vadd.f32 %v887_v34, %v885_v28 }
 0x826   :  { %889 = vrot.lane.b32.xlu2 %v888_v29, %s1358_s18 }
 0x880   :  { %v890_v30 = vpop.permute.xlu2 %889 }
 0x881   :  { %v891_v31 = vadd.f32 %v890_v30, %v888_v29 }
 0x883   :  { %892 = vrot.lane.b32.xlu0 %v891_v31, %s1350_s9 }
 0x8f5   :  { %v893_v32 = vpop.permute.xlu0 %892 }
 0x8f6   :  { %v894_v33 = vadd.f32 %v893_v32, %v891_v31 }
 0x8f8   :  { %v895_v62 = vmul.f32 0.001953125, %v894_v33 }
 0x8fa   :  { %v897_v35 = vadd.f32 1e-05, %v895_v62 }
 0x8fc   :  { %1245 = vrsqrt.f32 %v897_v35  ;;  %vm904_vm11 = vweird.f32 %v897_v35 }
 0x902   :  { %v1246_v60 = vpop.eup %1245 }
 0x903   :  { %v899_v36 = vmul.f32 %v1246_v60, %v897_v35  ;;  %vm905_vm10 = vweird.f32 %v1246_v60 }
 0x904   :  { %vm906_vm12 = vmor %vm904_vm11, %vm905_vm10 }
 0x905   :  { %v900_v4 = vmul.f32 %v1246_v60, %v899_v36 }
 0x907   :  { %v901_v37 = vmul.f32 0.5, %v900_v4 }
 0x909   :  { %v902_v0 = vsub.f32 1.5, %v901_v37 }
 0x90b   :  { %v903_v40 = vmul.f32 %v1246_v60, %v902_v0 }
 0x90d   :  { %v907_v41 = vsel %vm906_vm12, %v1246_v60, %v903_v40 }
 0x90e   :  { %v908_v42 = vmul.f32 %v907_v41, %v896_v39 }
 0x910   :  { %v910_v43 = vperm.slane %v908_v42, 0 }
 0x912   :  { %v912_v45 = vmul.f32 %v910_v43, %v863_v2  ;;  %v913_v46 = vmul.f32 %v910_v43, %v859_v61  ;;  %v914_v47 = vmul.f32 %v910_v43, %v865_v5  ;;  %v915_v48 = vmul.f32 %v910_v43, %v861_v6 }
 0x913   :  { %v916_v49 = vmul.f32 %v910_v43, %v867_v9 }
 0x914   :  { %v921_v50 = vadd.f32 %v1242_v44, %v912_v45  ;;  %v922_v51 = vadd.f32 %v1242_v44, %v913_v46  ;;  %v923_v52 = vadd.f32 %v1242_v44, %v914_v47  ;;  %v924_v53 = vadd.f32 %v1242_v44, %v915_v48 }
 0x915   :  { %v925_v54 = vadd.f32 %v1242_v44, %v916_v49 }
 0x916   :  { %v926_v1 = vadd.f32 %v921_v50, %v1427_v24  ;;  %v927_v55 = vadd.f32 %v922_v51, %v1429_v25  ;;  %v928_v56 = vadd.f32 %v923_v52, %v1441_v38  ;;  %v929_v57 = vadd.f32 %v924_v53, %v1416_v13 }
 0x917   :  { %v930_v58 = vadd.f32 %v925_v54, %v1418_v14 }
 0x918   :  { %v931_v59 = vmax.f32 %v926_v1, 0.0  ;;  %v932_v61 = vmax.f32 %v927_v55, 0.0  ;;  %v933_v63 = vmax.f32 %v928_v56, 0.0  ;;  %v934_v2 = vmax.f32 %v929_v57, 0.0 }
 0x919   :  { %v935_v3 = vmax.f32 %v930_v58, 0.0 }
 0x91a   :  { %v936_v5 = vadd.f32 %v931_v59, %v1427_v24  ;;  %v937_v6 = vadd.f32 %v932_v61, %v1429_v25  ;;  %v938_v7 = vadd.f32 %v933_v63, %v1441_v38  ;;  %v939_v8 = vadd.f32 %v934_v2, %v1416_v13 }
 0x91b   :  { %v940_v9 = vadd.f32 %v935_v3, %v1418_v14 }
 0x91c   :  { %v941_v10 = vmax.f32 %v936_v5, 0.0  ;;  %v942_v11 = vmax.f32 %v937_v6, 0.0  ;;  %v943_v12 = vmax.f32 %v938_v7, 0.0  ;;  %v944_v16 = vmax.f32 %v939_v8, 0.0 }
 0x91d   :  { %v945_v17 = vmax.f32 %v940_v9, 0.0 }
 0x91e   :  { %946 = vst [vmem:[#allocation8] sm:$0xff] %v941_v10 }
 0x91f   :  { %947 = vst [vmem:[#allocation8 + $0x8] sm:$0xff] %v942_v11 }
 0x920   :  { %948 = vst [vmem:[#allocation8 + $0x10] sm:$0xff] %v943_v12 }
 0x921   :  { %949 = vst [vmem:[#allocation8 + $0x18] sm:$0xff] %v944_v16 }
 0x922   :  { %950 = vst [vmem:[#allocation8 + $0x20] sm:$0xff] %v945_v17 }
 0x923   :  { %963 = dma.vmem_to_hbm [thread:$0]  %s956_s6, 640, %s958_s27, [#allocation4], %s1353_s13, %s1353_s13, %s1354_s1  }
 0x924   :  { %1347 = dma.done.wait [#allocation4], 640  }
 0x925   :  { %1348 = vsyncadd [#allocation4], 4294966656 }
 0x926   :  { %968 = vsyncpa [#allocation3], 1 }
 0x927   :  { %969 = vsyncpa [#allocation6], 1 }
 0x928   :  { %970 = vsyncpa [#allocation4], 1 }

</bundles_post_ra>
